<compile_context>
chip_gen: v7x
topology: tpu7x:2x2x1
jax: 0.10.0
libtpu: 0.0.40
codegen_flags: <defaults>
</compile_context>

<pallas_src>
import functools

import jax
import jax.numpy as jnp
from jax.experimental import pallas as pl
from jax.experimental.pallas import tpu as pltpu


def _round_up(x, m):
    return ((x + m - 1) // m) * m


def _cdiv(a, b):
    return (a + b - 1) // b


def _device_vmem_params():
    """(working-set budget, scoped VMEM limit) tuned per TPU generation."""
    kind = ""
    try:
        kind = jax.devices()[0].device_kind.lower()
    except Exception:
        pass
    if "v7" in kind:                      # v7x: 64 MiB physical VMEM per core
        return 14 * 2**20, 32 * 2**20
    return 28 * 2**20, 64 * 2**20         # v5e / v6e: 128 MiB physical VMEM


def _choose_tile_b(batch, n_classes, in_itemsize, ws_budget):
    """Largest batch tile whose full per-step working set (2 double-buffered
    native-dtype logits tiles + ~9 fp32 full-tile temporaries) fits the
    budget.  Sublane granularity follows the input dtype packing."""
    gran = {4: 8, 2: 16}.get(in_itemsize, 32)
    per_row = n_classes * (2 * in_itemsize + 9 * 4)
    tb = ws_budget // max(per_row, 1)
    cap = 2048 if n_classes <= 512 else 1024
    tb = max(gran, min(cap, (tb // gran) * gran))
    tb = min(tb, _round_up(batch, gran))
    return tb


def _balance_ce_kernel(logits_ref, labels_ref, acc_ref, *,
                       batch, tile_b, steps_per_core, n_classes, has_pad):
    """Accumulates into this core's (1, 3, C) block:
         row 0            : per-class softmax-Fisher trace  sum_b p*(1-p)
         row 1 (all lanes): cross-entropy sum               sum_b -log p[label]
         row 2 (all lanes): correct-prediction count
    """
    c = pl.program_id(0)
    i = pl.program_id(1)

    @pl.when(i == 0)
    def _init():
        acc_ref[...] = jnp.zeros_like(acc_ref)

    x = logits_ref[...].astype(jnp.float32)                     # (TB, C)
    labels = labels_ref[...]                                    # (TB, 1) int32

    # numerically stable softmax pieces
    m = jnp.max(x, axis=-1, keepdims=True)                      # (TB, 1)
    z = x - m
    ez = jnp.exp(z)
    se = jnp.sum(ez, axis=-1, keepdims=True)                    # (TB, 1)
    p = ez / se                                                 # exact: keeps p*(1-p) >= 0

    cls = jax.lax.broadcasted_iota(jnp.int32, (tile_b, n_classes), 1)
    is_true = cls == labels                                     # (TB, C) bool

    # per-row NLL without materializing logp: -log p_true = log(se) - z_true
    z_true = jnp.sum(jnp.where(is_true, z, 0.0), axis=-1, keepdims=True)
    nll = jnp.log(se) - z_true                                  # (TB, 1)

    # first-index-tie-break argmax (matches torch.argmax), int32 path
    pred = jnp.min(jnp.where(z >= 0.0, cls, n_classes), axis=-1, keepdims=True)
    corr = (pred == labels).astype(jnp.float32)                 # (TB, 1)

    fim = p - p * p                                             # (TB, C)

    if has_pad:
        # Emitted only when the batch really is padded.  Padded rows are
        # zero logits with out-of-range labels (== C), so only the trace and
        # the CE sum need this cheap row mask (corr is already 0 there).
        row0 = (c * steps_per_core + i) * tile_b
        rows = row0 + jax.lax.broadcasted_iota(jnp.int32, (tile_b, 1), 0)
        valid = (rows < batch).astype(jnp.float32)              # (TB, 1)
        fim = fim * valid
        nll = nll * valid

    trace_row = jnp.sum(fim, axis=0, keepdims=True)             # (1, C)
    ce_row = jnp.broadcast_to(jnp.sum(nll, axis=0, keepdims=True),
                              (1, n_classes))                   # (1, C)
    corr_row = jnp.broadcast_to(jnp.sum(corr, axis=0, keepdims=True),
                                (1, n_classes))                 # (1, C)
    acc_ref[...] += jnp.concatenate([trace_row, ce_row, corr_row], axis=0)[None]


def _run_kernel(logits, labels, *, batch, tile_b, steps_per_core, ncores,
                n_classes, has_pad, vmem_limit):
    kern = functools.partial(
        _balance_ce_kernel, batch=batch, tile_b=tile_b,
        steps_per_core=steps_per_core, n_classes=n_classes, has_pad=has_pad)
    grid = (ncores, steps_per_core)
    in_specs = [
        pl.BlockSpec((tile_b, n_classes),
                     lambda c, i: (c * steps_per_core + i, 0)),
        pl.BlockSpec((tile_b, 1),
                     lambda c, i: (c * steps_per_core + i, 0)),
    ]
    out_specs = pl.BlockSpec((1, 3, n_classes), lambda c, i: (c, 0, 0))
    out_shape = jax.ShapeDtypeStruct((ncores, 3, n_classes), jnp.float32)
    return pl.pallas_call(
        kern,
        out_shape=out_shape,
        grid=grid,
        in_specs=in_specs,
        out_specs=out_specs,
        compiler_params=pltpu.CompilerParams(
            dimension_semantics=("parallel", "arbitrary"),
            vmem_limit_bytes=vmem_limit,
        ),
    )(logits, labels)


@functools.partial(jax.jit, static_argnames=("num_classes", "fpw", "use_log"))
def _balance_penalty_compute(y_pred, y_true, *, num_classes, fpw, use_log):
    B, C = y_pred.shape
    ws_budget, vmem_limit = _device_vmem_params()
    tile_b = _choose_tile_b(B, C, y_pred.dtype.itemsize, ws_budget)

    total_tiles = _cdiv(B, tile_b)
    ncores = 2 if total_tiles >= 2 else 1
    steps_per_core = _cdiv(total_tiles, ncores)
    b_pad = ncores * steps_per_core * tile_b
    has_pad = b_pad != B

    labels = y_true.astype(jnp.int32).reshape(B, 1)
    logits = y_pred                                  # native dtype, no fp32 copy
    if has_pad:
        # batch-remainder pad only; labels padded out-of-range (== C)
        logits = jnp.pad(logits, ((0, b_pad - B), (0, 0)))
        labels = jnp.pad(labels, ((0, b_pad - B), (0, 0)), constant_values=C)

    parts = _run_kernel(logits, labels, batch=B, tile_b=tile_b,
                        steps_per_core=steps_per_core, ncores=ncores,
                        n_classes=C, has_pad=has_pad, vmem_limit=vmem_limit)

    traces = jnp.sum(parts[:, 0, :], axis=0)         # (C,)
    ce_sum = jnp.sum(parts[:, 1, 0])
    correct = jnp.sum(parts[:, 2, 0])

    ce_loss = ce_sum / B
    accuracy = correct / B

    eps = 1e-12
    sum_of_fims = jnp.sum(traces)
    mean_ratio = jnp.max(traces) / (jnp.min(traces) + eps)

    combined_loss = ce_loss
    if fpw > 0:
        reg_part = jnp.log(mean_ratio) if use_log else mean_ratio - 1.0
        combined_loss = ce_loss + fpw * (reg_part - sum_of_fims)

    return ce_loss, combined_loss, accuracy, mean_ratio, traces


def balance_penalty_loss_forward(y_pred, y_true, num_classes, fpw=0.0,
                                 use_log=False):
    """Mirrors BalancePenaltyLoss.forward(y_pred, y_true) -> (loss, evaluators)."""
    outs = _balance_penalty_compute(y_pred, y_true, num_classes=int(num_classes),
                                    fpw=float(fpw), use_log=bool(use_log))
    loss_dev = outs[1]  # device-side (combined) loss tensor

    # single host transfer for all evaluator scalars (no per-scalar syncs)
    ce_loss, combined_loss, acc, mean_ratio, traces = jax.device_get(outs)

    evaluators = {
        'loss': float(ce_loss),
        'acc': float(acc),
        'balance_penalty/mean_ratio': float(mean_ratio),
    }
    evaluators.update({f'balance_penalty/trace_{c}': float(traces[c])
                       for c in range(int(num_classes))})
    if fpw > 0:
        evaluators['balance_penalty/combined_loss'] = float(combined_loss)

    return loss_dev, evaluators


if __name__ == "__main__":
    key = jax.random.PRNGKey(0)
    k_logits, k_labels = jax.random.split(key)

    B, NUM_CLASSES = 8, 16
    y_pred = jax.random.normal(k_logits, (B, NUM_CLASSES), dtype=jnp.float32)
    y_true = jax.random.randint(k_labels, (B,), 0, NUM_CLASSES, dtype=jnp.int32)

    loss, evaluators = balance_penalty_loss_forward(
        y_pred, y_true, num_classes=NUM_CLASSES, fpw=0.5, use_log=True)

    jax.block_until_ready(loss)
    print("KERNEL_OK")
</pallas_src>

<mosaic_0001>
module attributes {stable_mosaic.version = 11 : i64} {
  func.func @_balance_ce_kernel(%arg0: i32, %arg1: i32, %arg2: memref<8x16xf32, #tpu.memory_space<vmem>>, %arg3: memref<8x1xi32, #tpu.memory_space<vmem>>, %arg4: memref<1x3x16xf32, #tpu.memory_space<vmem>>) attributes {dimension_semantics = [#tpu.dimension_semantics<parallel>, #tpu.dimension_semantics<arbitrary>], iteration_bounds = array<i64: 1, 1>, scalar_prefetch = 0 : i64, scratch_operands = 0 : i64, tpu.core_type = #tpu.core_type<tc>, window_params = [{transform_indices = @transform_0, window_bounds = array<i64: 8, 16>}, {transform_indices = @transform_1, window_bounds = array<i64: 8, 1>}, {transform_indices = @transform_2, window_bounds = array<i64: 1, 3, 16>}]} {
    %c0_i32 = arith.constant 0 : i32
    %0 = arith.cmpi eq, %arg1, %c0_i32 : i32
    %1 = arith.extui %0 : i1 to i32
    %c0_i32_0 = arith.constant 0 : i32
    %2 = arith.cmpi ne, %1, %c0_i32_0 : i32
    scf.if %2 {
      %cst_18 = arith.constant 0.000000e+00 : f32
      %49 = vector.broadcast %cst_18 : f32 to vector<1x3x16xf32>
      %c0_19 = arith.constant 0 : index
      %c0_20 = arith.constant 0 : index
      %c0_21 = arith.constant 0 : index
      %50 = vector.load %arg4[%c0_19, %c0_20, %c0_21] : memref<1x3x16xf32, #tpu.memory_space<vmem>>, vector<1x3x16xf32>
      tpu.vector_store %arg4[%c0_19, %c0_20, %c0_21], %49 {strides = array<i32>} : memref<1x3x16xf32, #tpu.memory_space<vmem>>, vector<1x3x16xf32>,
    } else {
    }
    %c0 = arith.constant 0 : index
    %c0_1 = arith.constant 0 : index
    %3 = vector.load %arg2[%c0, %c0_1] : memref<8x16xf32, #tpu.memory_space<vmem>>, vector<8x16xf32>
    %c0_2 = arith.constant 0 : index
    %c0_3 = arith.constant 0 : index
    %4 = vector.load %arg3[%c0_2, %c0_3] : memref<8x1xi32, #tpu.memory_space<vmem>>, vector<8x1xi32>
    %cst = arith.constant dense<0xFF800000> : vector<8xf32>
    %5 = vector.multi_reduction <maximumf>, %3, %cst [1] : vector<8x16xf32> to vector<8xf32>
    %6 = vector.shape_cast %5 : vector<8xf32> to vector<8x1xf32>
    %7 = vector.broadcast %6 : vector<8x1xf32> to vector<8x16xf32>
    %8 = arith.subf %3, %7 : vector<8x16xf32>
    %9 = math.exp %8 : vector<8x16xf32>
    %cst_4 = arith.constant dense<0.000000e+00> : vector<8xf32>
    %10 = vector.multi_reduction <add>, %9, %cst_4 [1] : vector<8x16xf32> to vector<8xf32>
    %11 = vector.shape_cast %10 : vector<8xf32> to vector<8x1xf32>
    %12 = vector.broadcast %11 : vector<8x1xf32> to vector<8x16xf32>
    %13 = arith.divf %9, %12 : vector<8x16xf32>
    %14 = tpu.iota {dimensions = array<i32: 1>} : vector<8x16xi32>
    %15 = vector.broadcast %4 : vector<8x1xi32> to vector<8x16xi32>
    %16 = arith.cmpi eq, %14, %15 : vector<8x16xi32>
    %cst_5 = arith.constant 0.000000e+00 : f32
    %17 = vector.broadcast %cst_5 : f32 to vector<8x16xf32>
    %18 = arith.select %16, %8, %17 : vector<8x16xi1>, vector<8x16xf32>
    %cst_6 = arith.constant dense<0.000000e+00> : vector<8xf32>
    %19 = vector.multi_reduction <add>, %18, %cst_6 [1] : vector<8x16xf32> to vector<8xf32>
    %20 = vector.shape_cast %19 : vector<8xf32> to vector<8x1xf32>
    %21 = math.log %11 : vector<8x1xf32>
    %22 = arith.subf %21, %20 : vector<8x1xf32>
    %cst_7 = arith.constant 0.000000e+00 : f32
    %23 = vector.broadcast %cst_7 : f32 to vector<8x16xf32>
    %24 = arith.cmpf oge, %8, %23 : vector<8x16xf32>
    %c16_i32 = arith.constant 16 : i32
    %25 = vector.broadcast %c16_i32 : i32 to vector<8x16xi32>
    %26 = arith.select %24, %14, %25 : vector<8x16xi1>, vector<8x16xi32>
    %cst_8 = arith.constant dense<2147483647> : vector<8xi32>
    %27 = vector.multi_reduction <minsi>, %26, %cst_8 [1] : vector<8x16xi32> to vector<8xi32>
    %28 = vector.shape_cast %27 : vector<8xi32> to vector<8x1xi32>
    %29 = arith.cmpi eq, %28, %4 : vector<8x1xi32>
    %30 = arith.extui %29 : vector<8x1xi1> to vector<8x1xi32>
    %31 = arith.sitofp %30 : vector<8x1xi32> to vector<8x1xf32>
    %32 = arith.mulf %13, %13 : vector<8x16xf32>
    %33 = arith.subf %13, %32 : vector<8x16xf32>
    %cst_9 = arith.constant dense<0.000000e+00> : vector<16xf32>
    %34 = vector.multi_reduction <add>, %33, %cst_9 [0] : vector<8x16xf32> to vector<16xf32>
    %35 = vector.shape_cast %34 : vector<16xf32> to vector<1x16xf32>
    %cst_10 = arith.constant dense<0.000000e+00> : vector<1xf32>
    %36 = vector.multi_reduction <add>, %22, %cst_10 [0] : vector<8x1xf32> to vector<1xf32>
    %37 = vector.shape_cast %36 : vector<1xf32> to vector<1x1xf32>
    %38 = vector.shape_cast %37 : vector<1x1xf32> to vector<1x1xf32>
    %39 = vector.broadcast %38 : vector<1x1xf32> to vector<1x16xf32>
    %cst_11 = arith.constant dense<0.000000e+00> : vector<1xf32>
    %40 = vector.multi_reduction <add>, %31, %cst_11 [0] : vector<8x1xf32> to vector<1xf32>
    %41 = vector.shape_cast %40 : vector<1xf32> to vector<1x1xf32>
    %42 = vector.shape_cast %41 : vector<1x1xf32> to vector<1x1xf32>
    %43 = vector.broadcast %42 : vector<1x1xf32> to vector<1x16xf32>
    %c0_12 = arith.constant 0 : index
    %c0_13 = arith.constant 0 : index
    %c0_14 = arith.constant 0 : index
    %44 = vector.load %arg4[%c0_12, %c0_13, %c0_14] : memref<1x3x16xf32, #tpu.memory_space<vmem>>, vector<1x3x16xf32>
    %45 = tpu.concatenate %35, %39, %43 in 0 : vector<1x16xf32>, vector<1x16xf32>, vector<1x16xf32> -> vector<3x16xf32>
    %46 = vector.shape_cast %45 : vector<3x16xf32> to vector<1x3x16xf32>
    %47 = arith.addf %44, %46 : vector<1x3x16xf32>
    %c0_15 = arith.constant 0 : index
    %c0_16 = arith.constant 0 : index
    %c0_17 = arith.constant 0 : index
    %48 = vector.load %arg4[%c0_15, %c0_16, %c0_17] : memref<1x3x16xf32, #tpu.memory_space<vmem>>, vector<1x3x16xf32>
    tpu.vector_store %arg4[%c0_15, %c0_16, %c0_17], %47 {strides = array<i32>} : memref<1x3x16xf32, #tpu.memory_space<vmem>>, vector<1x3x16xf32>,
    return
  }
  func.func @transform_0(%arg0: i32, %arg1: i32) -> (i32, i32) {
    %c1_i32 = arith.constant 1 : i32
    %0 = arith.muli %arg0, %c1_i32 : i32
    %1 = arith.addi %0, %arg1 : i32
    %c0_i32 = arith.constant 0 : i32
    %c0_i32_0 = arith.constant 0 : i32
    return %1, %c0_i32 : i32, i32
  }
  func.func @transform_1(%arg0: i32, %arg1: i32) -> (i32, i32) {
    %c1_i32 = arith.constant 1 : i32
    %0 = arith.muli %arg0, %c1_i32 : i32
    %1 = arith.addi %0, %arg1 : i32
    %c0_i32 = arith.constant 0 : i32
    %c0_i32_0 = arith.constant 0 : i32
    return %1, %c0_i32 : i32, i32
  }
  func.func @transform_2(%arg0: i32, %arg1: i32) -> (i32, i32, i32) {
    %c0_i32 = arith.constant 0 : i32
    %c0_i32_0 = arith.constant 0 : i32
    %c0_i32_1 = arith.constant 0 : i32
    return %arg0, %c0_i32, %c0_i32_0 : i32, i32, i32
  }
}

</mosaic_0001>

<bundles_post_ra>
// kernel: _balance_penalty_compute.1
= control target key start
LH: loop header
LB: loop body
LE: loop exit
PB: predicated region body
PF: predicated region fallthrough
CT: control target
= control target key end

     0   :  { %7 = vsyncpa [#allocation3], 0  ;;  %s298_s0 = inlined_call_operand.hbm [shape: f32[8,16], index: 0, kind: input, shape index: {}]   ;;  %s299_s1 = inlined_call_operand.hbm [shape: s32[8,1], index: 1, kind: input, shape index: {}]   ;;  %s300_s2 = inlined_call_operand.hbm [shape: f32[1,3,16], index: 2, kind: output, shape index: {}]  }
   0x1   :  { %8 = vsyncpa [#allocation6], 0 }
   0x2   :  { %9 = vsyncpa [#allocation4], 0  ;;  %s235_s9 = smov [#allocation2]   ;;  %s236_s11 = smov [#allocation5]  }
   0x3   :  { %s19_s10 = sshll.u32 %s235_s9, 4  ;;  %s32_s12 = sshll.u32 %s236_s11, 4  ;;  %s20_s10 = int_to_ptr.vmem [resolvable:$true] %s19_s10  ;;  %s33_s12 = int_to_ptr.vmem [resolvable:$true] %s32_s12 }
   0x4   :  { %s163_s15 = scalar_lea.hbm %s298_s0, 128 }
   0x5   :  { %p164_p0 = scmp.ne.s32.totalorder %s298_s0, %s163_s15  ;;  %p167_p1 = scmp.lt.u32.totalorder %s163_s15, %s298_s0 }
   0x7   :  { %p169_p2 = pnand %p167_p1, %p164_p0 }
   0x9   :  { %172 = shalt.err (!%p169_p2)
}
   0xa   :  { %s173_s20 = scalar_lea.vmem %s20_s10, 128  ;;  %p178_p4 = scmp.lt.s32.totalorder %s20_s10, %s20_s10 }
   0xb   :  { %p174_p3 = scmp.ne.s32.totalorder %s20_s10, %s173_s20  ;;  %p179_p5 = scmp.lt.s32.totalorder %s173_s20, %s173_s20 }
   0xd   :  { %p180_p6 = por %p179_p5, %p178_p4 }
   0xf   :  { %p181_p7 = pnand %p180_p6, %p174_p3 }
  0x11   :  { %184 = shalt.err (!%p181_p7)
}
  0x12   :  { %22 = dma.hbm_to_vmem [thread:$0]  %s298_s0, 128, %s20_s10, [#allocation3]  }
  0x13   :  { %s185_s25 = scalar_lea.hbm %s299_s1, 128 }
  0x14   :  { %p186_p8 = scmp.ne.s32.totalorder %s299_s1, %s185_s25  ;;  %p189_p9 = scmp.lt.u32.totalorder %s185_s25, %s299_s1 }
  0x16   :  { %p191_p10 = pnand %p189_p9, %p186_p8 }
  0x18   :  { %194 = shalt.err (!%p191_p10)
}
  0x19   :  { %s195_s30 = scalar_lea.vmem %s33_s12, 128  ;;  %p200_p12 = scmp.lt.s32.totalorder %s33_s12, %s33_s12 }
  0x1a   :  { %p196_p11 = scmp.ne.s32.totalorder %s33_s12, %s195_s30  ;;  %p201_p13 = scmp.lt.s32.totalorder %s195_s30, %s195_s30 }
  0x1c   :  { %p202_p0 = por %p201_p13, %p200_p12 }
  0x1e   :  { %p203_p1 = pnand %p202_p0, %p196_p11 }
  0x20   :  { %206 = shalt.err (!%p203_p1)
}
  0x21   :  { %35 = dma.hbm_to_vmem [thread:$0]  %s299_s1, 128, %s33_s12, [#allocation6]  }
  0x22   :  { %229 = dma.done.wait [#allocation3], 128  }
  0x23   :  { %230 = vsyncadd [#allocation3], 4294967168 }
  0x24   :  { %231 = dma.done.wait [#allocation6], 128  }
  0x25   :  { %232 = vsyncadd [#allocation6], 4294967168  ;;  %vm52_vm0 = vcmask 130048   ;;  %v50_v0 = vld [vmem:[#allocation2] sm:$0xff]  ;;  %v64_v2 = vlaneseq  ;;  %v237_v13 = vmov 0   ;;  %vm48_vm2 = vcmask 124928  }
  0x26   :  { %v53_v1 = vsel %vm52_vm0, %v50_v0, -inf  ;;  %155 = vset.pattern.permute.xlu1 %v237_v13  ;;  %156 = vset.pattern.permute.xlu0 %v237_v13  ;;  %v238_v14 = vmov 0.0   ;;  %v51_v19 = vld [vmem:[#allocation5] sm:$0xff]  ;;  %vm112_vm4 = vcmask 7168   ;;  %vm126_vm7 = vcmask 1040384   ;;  %s239_s1 = smov [#allocation7]  }
  0x27   :  { %54 = vmax.xlane.f32.xlu0 %v53_v1  ;;  %v65_v4 = vand.u32 127, %v64_v2  ;;  %49 = vst.msk [vmem:[#allocation7] sm:$0x7] %vm48_vm2, %v238_v14  ;;  %vm128_vm8 = vcmask 1041408   ;;  %s139_s4 = sshll.u32 %s239_s1, 4  ;;  %s140_s4 = int_to_ptr.vmem [resolvable:$true] %s139_s4 }
  0x28   :  { %s207_s5 = scalar_lea.vmem %s140_s4, 64  ;;  %p212_p3 = scmp.lt.s32.totalorder %s140_s4, %s140_s4 }
  0x29   :  { %p208_p2 = scmp.ne.s32.totalorder %s140_s4, %s207_s5  ;;  %p213_p4 = scmp.lt.s32.totalorder %s207_s5, %s207_s5 }
  0x2b   :  { %p214_p5 = por %p213_p4, %p212_p3 }
  0x2d   :  { %p215_p6 = pnand %p214_p5, %p208_p2 }
  0x2e   :  { %v125_v58 = vld [vmem:[#allocation7] sm:$0x7] }
  0xb4   :  { %v55_v3 = vpop.xlane.xlu0 %54 }
  0xb5   :  { %v56_v5 = vsub.f32 %v50_v0, %v55_v3 }
  0xb7   :  { %v57_v6 = vmul.f32 1.442695, %v56_v5  ;;  %vm77_vm1 = vcmp.ge.f32.partialorder %v56_v5, 0.0 }
  0xb8   :  { %v78_v7 = vsel %vm77_vm1, %v65_v4, 16 }
  0xb9   :  { %157 = vpow2.f32 %v57_v6  ;;  %v79_v8 = vsel %vm52_vm0, %v78_v7, 2147483647 }
  0xba   :  { %v81_v9 = vshra.s32 %v79_v8, 16  ;;  %v80_v15 = vand.u32 65535, %v79_v8 }
  0xbc   :  { %v83_v10 = vcvt.s32.f32 %v81_v9  ;;  %v82_v17 = vcvt.s32.f32 %v80_v15 }
  0xbe   :  { %84 = vmin.xlane.f32.xlu0 %v83_v10 }
  0xc3   :  { %v158_v11 = vpop.eup %157 }
  0xc4   :  { %v59_v12 = vsel %vm52_vm0, %v158_v11, 0.0 }
  0xc5   :  { %60 = vadd.xlane.f32.xlu0 %v59_v12 }
 0x14b   :  { %v85_v16 = vpop.xlane.xlu0 %84 }
 0x14c   :  { %vm86_vm3 = vcmp.eq.f32.partialorder %v83_v10, %v85_v16  ;;  %v91_v20 = vcvt.f32.s32 %v85_v16 }
 0x14d   :  { %v87_v18 = vsel %vm86_vm3, %v82_v17, inf }
 0x14e   :  { %88 = vmin.xlane.f32.xlu1 %v87_v18  ;;  %v92_v22 = vshll.u32 %v91_v20, 16 }
 0x152   :  { %v61_v36 = vpop.xlane.xlu0 %60 }
 0x153   :  { %159 = vrcp.f32 %v61_v36 }
 0x154   :  { %161 = vlog2.f32 %v61_v36 }
 0x15d   :  { %v160_v37 = vpop.eup %159 }
 0x15e   :  { %v63_v38 = vmul.f32 %v160_v37, %v158_v11  ;;  %v162_v43 = vpop.eup %161 }
 0x15f   :  { %67 = vperm.xlu1 %155, %v51_v19   ;;  %v75_v45 = vmul.f32 0.6931472, %v162_v43 }
 0x160   :  { %v97_v39 = vmul.f32 %v63_v38, %v63_v38 }
 0x162   :  { %v98_v40 = vsub.f32 %v63_v38, %v97_v39 }
 0x164   :  { %v99_v41 = vsel %vm52_vm0, %v98_v40, 0.0 }
 0x165   :  { %v100_v42 = vrot.slane %v99_v41, 4 }
 0x167   :  { %v101_v44 = vadd.f32 %v100_v42, %v99_v41 }
 0x169   :  { %v102_v48 = vrot.slane %v101_v44, 2 }
 0x16b   :  { %v103_v51 = vadd.f32 %v102_v48, %v101_v44 }
 0x16d   :  { %v104_v54 = vrot.slane %v103_v51, 1 }
 0x16f   :  { %v105_v57 = vadd.f32 %v104_v54, %v103_v51 }
 0x1db   :  { %v89_v21 = vpop.xlane.xlu1 %88 }
 0x1dc   :  { %v90_v23 = vcvt.f32.s32 %v89_v21 }
 0x1de   :  { %v93_v24 = vadd.s32 %v92_v22, %v90_v23 }
 0x1df   :  { %v68_v25 = vpop.permute.xlu1 %67 }
 0x1e0   :  { %vm94_vm5 = vcmp.eq.s32.totalorder %v93_v24, %v51_v19  ;;  %vm69_vm6 = vcmp.eq.s32.totalorder %v65_v4, %v68_v25 }
 0x1e1   :  { %v149_v26 = vsel %vm94_vm5, 1.0, %v238_v14  ;;  %v70_v27 = vsel %vm69_vm6, %v56_v5, 0.0 }
 0x1e2   :  { %v113_v28 = vsel %vm112_vm4, %v149_v26, 0.0  ;;  %v71_v29 = vsel %vm52_vm0, %v70_v27, 0.0 }
 0x1e3   :  { %v114_v30 = vrot.slane %v113_v28, 4  ;;  %72 = vadd.xlane.f32.xlu0 %v71_v29 }
 0x1e5   :  { %v115_v31 = vadd.f32 %v114_v30, %v113_v28 }
 0x1e7   :  { %v116_v32 = vrot.slane %v115_v31, 2 }
 0x1e9   :  { %v117_v33 = vadd.f32 %v116_v32, %v115_v31 }
 0x1eb   :  { %v118_v34 = vrot.slane %v117_v33, 1 }
 0x1ed   :  { %v119_v35 = vadd.f32 %v118_v34, %v117_v33 }
 0x1f9   :  { %122 = vperm.xlu0 %156, %v119_v35  }
 0x270   :  { %v73_v46 = vpop.xlane.xlu0 %72 }
 0x271   :  { %v76_v47 = vsub.f32 %v75_v45, %v73_v46 }
 0x273   :  { %v106_v49 = vrot.slane %v76_v47, 4 }
 0x275   :  { %v107_v50 = vadd.f32 %v106_v49, %v76_v47 }
 0x277   :  { %v108_v52 = vrot.slane %v107_v50, 2 }
 0x278   :  { %v123_v60 = vpop.permute.xlu0 %122 }
 0x279   :  { %v109_v53 = vadd.f32 %v108_v52, %v107_v50 }
 0x27b   :  { %v110_v55 = vrot.slane %v109_v53, 1 }
 0x27d   :  { %v111_v56 = vadd.f32 %v110_v55, %v109_v53 }
 0x27f   :  { %v127_v59 = vsel %vm126_vm7, %v105_v57, %v111_v56 }
 0x280   :  { %v129_v61 = vsel %vm128_vm8, %v127_v59, %v123_v60 }
 0x281   :  { %v130_v62 = vadd.f32 %v129_v61, %v125_v58 }
 0x283   :  { %132 = vst.msk [vmem:[#allocation7] sm:$0x7] %vm48_vm2, %v130_v62 }
 0x284   :  { %218 = shalt.err (!%p215_p6)
}
 0x285   :  { %s219_s8 = scalar_lea.hbm %s300_s2, 64 }
 0x286   :  { %p220_p7 = scmp.ne.s32.totalorder %s300_s2, %s219_s8  ;;  %p223_p8 = scmp.lt.u32.totalorder %s219_s8, %s300_s2 }
 0x288   :  { %p225_p9 = pnand %p223_p8, %p220_p7 }
 0x28a   :  { %228 = shalt.err (!%p225_p9)
}
 0x28b   :  { %142 = dma.vmem_to_hbm [thread:$0]  %s140_s4, 64, %s300_s2, [#allocation4]  }
 0x28c   :  { %233 = dma.done.wait [#allocation4], 64  }
 0x28d   :  { %234 = vsyncadd [#allocation4], 4294967232 }
 0x28e   :  { %146 = vsyncpa [#allocation3], 1 }
 0x28f   :  { %147 = vsyncpa [#allocation6], 1 }
 0x290   :  { %148 = vsyncpa [#allocation4], 1 }

</bundles_post_ra>
